<compile_context>
chip_gen: v7x
topology: tpu7x:2x2x1
jax: 0.10.0
libtpu: 0.0.40
codegen_flags: <defaults>
</compile_context>

<pallas_src>
import functools

import jax
import jax.numpy as jnp
from jax.experimental import pallas as pl
from jax.experimental.pallas import tpu as pltpu

H = 25        # fc_1 out_features in the PyTorch module
H_PAD = 128   # zero-padded hidden dim (lane-dense)
O = 1         # last_layer out_features


def _round_up(n, m):
    return (n + m - 1) // m * m


def _mlp_kernel(x_ref, w1t_ref, b1_ref, w2row_ref, b2_ref, o_ref):
    # x:     [TB, F]    (VMEM, pipelined over the batch grid)
    # w1t:   [F, 128]   (VMEM-resident; cols >= 25 are zero)
    # b1:    [1, 128]   (VMEM-resident; entries >= 25 are zero)
    # w2row: [1, 128]   (VMEM-resident; entries >= 25 are zero)
    # b2:    [1]        (SMEM scalar)
    # o:     [TB, 1]
    x = x_ref[...]
    # Layer 1 on the MXU with f32 accumulation.
    h = jnp.dot(x, w1t_ref[...], preferred_element_type=jnp.float32) + b1_ref[...]
    h = jnp.maximum(h, 0.0)  # ReLU; padded columns stay exactly zero
    # Layer 2 (output width 1): VPU multiply + cross-lane reduce (XLU), not MXU.
    y = jnp.sum(h * w2row_ref[...], axis=-1, keepdims=True) + b2_ref[0]
    o_ref[...] = y.astype(o_ref.dtype)


def prepare_params(w1, b1, w2, b2):
    """One-time preprocessing: transpose + zero-pad the hidden dim to 128."""
    F = w1.shape[1]
    w1t_pad = jnp.zeros((F, H_PAD), jnp.float32).at[:, :H].set(w1.T.astype(jnp.float32))
    b1_pad = jnp.zeros((1, H_PAD), jnp.float32).at[0, :H].set(b1.astype(jnp.float32))
    w2row_pad = jnp.zeros((1, H_PAD), jnp.float32).at[0, :H].set(
        w2.reshape(-1).astype(jnp.float32))
    b2_s = b2.reshape(1).astype(jnp.float32)
    return w1t_pad, b1_pad, w2row_pad, b2_s


def _choose_tb(B, F, tb):
    """Batch tile: multiple of 8, large enough to amortize per-step overhead,
    >= 2 grid steps for v7x megacore sharding, and within a VMEM budget."""
    # Keep at least 2 grid steps on medium/large B (v7x: both TensorCores busy).
    half = _round_up(pl.cdiv(B, 2), 8)
    TB = max(8, min(tb, half))
    # VMEM budget against the tightest scoped default (v5e: 16 MiB; v7x: 32 MiB).
    # Dominant per-row bytes: 2*F*4 (double-buffered x) + 128*4 (f32 hidden temp)
    #                         + 2*O*4 (double-buffered out).
    per_row_bytes = 2 * F * 4 + H_PAD * 4 + 2 * O * 4
    tb_cap = max(8, (12 * 1024 * 1024 // per_row_bytes) // 8 * 8)
    return min(TB, tb_cap)


@functools.partial(jax.jit, static_argnames=("tb",))
def regression_model_forward(x, w1t_pad, b1_pad, w2row_pad, b2_s, *, tb=8192):
    """x: [B, n_features] f32; params from prepare_params(). Returns [B, 1] f32."""
    B, F = x.shape
    TB = _choose_tb(B, F, tb)
    grid = (pl.cdiv(B, TB),)   # ragged last block handled by Pallas; no jnp.pad copy

    # Real work: 2*B*F*H matmul flops (H=25, not the padded 128) + small epilogue.
    flops = 2 * B * F * H + 4 * B * H
    bytes_accessed = (B * F + B * O) * 4 + (F * H_PAD + 2 * H_PAD + 1) * 4

    return pl.pallas_call(
        _mlp_kernel,
        out_shape=jax.ShapeDtypeStruct((B, O), jnp.float32),
        grid=grid,
        in_specs=[
            pl.BlockSpec((TB, F), lambda i: (i, 0)),              # x, pipelined
            pl.BlockSpec((F, H_PAD), lambda i: (0, 0)),           # W1^T, resident
            pl.BlockSpec((1, H_PAD), lambda i: (0, 0)),           # b1, resident
            pl.BlockSpec((1, H_PAD), lambda i: (0, 0)),           # w2 row, resident
            pl.BlockSpec(memory_space=pltpu.MemorySpace.SMEM),    # b2 scalar
        ],
        out_specs=pl.BlockSpec((TB, O), lambda i: (i, 0)),
        compiler_params=pltpu.CompilerParams(
            dimension_semantics=("parallel",)),
        cost_estimate=pl.CostEstimate(
            flops=flops, transcendentals=0, bytes_accessed=bytes_accessed),
    )(x, w1t_pad, b1_pad, w2row_pad, b2_s)


def _torch_like_linear_init(key, out_features, in_features):
    # Deterministic init mimicking nn.Linear's U(-1/sqrt(fan_in), 1/sqrt(fan_in)).
    kw, kb = jax.random.split(key)
    bound = 1.0 / jnp.sqrt(jnp.float32(in_features))
    w = jax.random.uniform(kw, (out_features, in_features), jnp.float32, -bound, bound)
    b = jax.random.uniform(kb, (out_features,), jnp.float32, -bound, bound)
    return w, b


if __name__ == "__main__":
    n_features = 32

    key = jax.random.PRNGKey(0)
    kx, k1, k2, kx2, kx3 = jax.random.split(key, 5)

    w1, b1 = _torch_like_linear_init(k1, H, n_features)   # fc_1
    w2, b2 = _torch_like_linear_init(k2, O, H)             # last_layer
    params = prepare_params(w1, b1, w2, b2)                # one-time, hoisted

    def ref_fwd(xx):  # plain-JAX reference (same math as the PyTorch forward)
        hh = jnp.maximum(
            jax.lax.dot(xx, w1.T, precision=jax.lax.Precision.HIGHEST) + b1, 0.0)
        return jax.lax.dot(hh, w2.T, precision=jax.lax.Precision.HIGHEST) + b2

    # Small-batch check (batch=8, n_features=32) -> single grid step, TB=8.
    x = jax.random.normal(kx, (8, n_features), jnp.float32)
    y = regression_model_forward(x, *params)
    jax.block_until_ready(y)
    assert y.shape == (8, O)
    assert jnp.allclose(y, ref_fwd(x), atol=1e-5, rtol=1e-5)

    # Two even grid steps (v7x two-TC path): B=528 -> TB=264, grid=(2,), no padding.
    x2 = jax.random.normal(kx2, (528, n_features), jnp.float32)
    y2 = regression_model_forward(x2, *params)
    jax.block_until_ready(y2)
    assert y2.shape == (528, O)
    assert jnp.allclose(y2, ref_fwd(x2), atol=1e-5, rtol=1e-5)

    # Ragged last block with no wrapper-side padding: B=1000, TB forced to 128.
    x3 = jax.random.normal(kx3, (1000, n_features), jnp.float32)
    y3 = regression_model_forward(x3, *params, tb=128)
    jax.block_until_ready(y3)
    assert y3.shape == (1000, O)
    assert jnp.allclose(y3, ref_fwd(x3), atol=1e-5, rtol=1e-5)

    print("KERNEL_OK")
</pallas_src>

<mosaic_0001>
module attributes {stable_mosaic.version = 11 : i64} {
  func.func @_mlp_kernel(%arg0: i32, %arg1: memref<8x32xf32, #tpu.memory_space<vmem>>, %arg2: memref<32x128xf32, #tpu.memory_space<vmem>>, %arg3: memref<1x128xf32, #tpu.memory_space<vmem>>, %arg4: memref<1x128xf32, #tpu.memory_space<vmem>>, %arg5: memref<1xf32, #tpu.memory_space<smem>>, %arg6: memref<8x1xf32, #tpu.memory_space<vmem>>) attributes {dimension_semantics = [#tpu.dimension_semantics<parallel>], iteration_bounds = array<i64: 1>, scalar_prefetch = 0 : i64, scratch_operands = 0 : i64, tpu.core_type = #tpu.core_type<tc>, window_params = [{transform_indices = @transform_0, window_bounds = array<i64: 8, 32>}, {pipeline_mode = #tpu.pipeline_mode<synchronous>, transform_indices = @transform_1, window_bounds = array<i64: 32, 128>}, {pipeline_mode = #tpu.pipeline_mode<synchronous>, transform_indices = @transform_2, window_bounds = array<i64: 1, 128>}, {pipeline_mode = #tpu.pipeline_mode<synchronous>, transform_indices = @transform_3, window_bounds = array<i64: 1, 128>}, {transform_indices = @transform_4, window_bounds = array<i64: 1>}, {transform_indices = @transform_5, window_bounds = array<i64: 8, 1>}]} {
    %c0 = arith.constant 0 : index
    %c0_0 = arith.constant 0 : index
    %0 = vector.load %arg1[%c0, %c0_0] : memref<8x32xf32, #tpu.memory_space<vmem>>, vector<8x32xf32>
    %c0_1 = arith.constant 0 : index
    %c0_2 = arith.constant 0 : index
    %1 = vector.load %arg2[%c0_1, %c0_2] : memref<32x128xf32, #tpu.memory_space<vmem>>, vector<32x128xf32>
    %cst = arith.constant dense<0.000000e+00> : vector<8x128xf32>
    %2 = tpu.matmul %0, %1, %cst {dimension_numbers = #tpu.dot_dimension_numbers<[1], [0], [0], [1], [0, 0, 1, 1], [], []>} : vector<8x32xf32>, vector<32x128xf32>, vector<8x128xf32> -> vector<8x128xf32>
    %c0_3 = arith.constant 0 : index
    %c0_4 = arith.constant 0 : index
    %3 = vector.load %arg3[%c0_3, %c0_4] : memref<1x128xf32, #tpu.memory_space<vmem>>, vector<1x128xf32>
    %4 = vector.broadcast %3 : vector<1x128xf32> to vector<8x128xf32>
    %5 = arith.addf %2, %4 : vector<8x128xf32>
    %cst_5 = arith.constant 0.000000e+00 : f32
    %6 = vector.broadcast %cst_5 : f32 to vector<8x128xf32>
    %7 = arith.maximumf %5, %6 : vector<8x128xf32>
    %c0_6 = arith.constant 0 : index
    %c0_7 = arith.constant 0 : index
    %8 = vector.load %arg4[%c0_6, %c0_7] : memref<1x128xf32, #tpu.memory_space<vmem>>, vector<1x128xf32>
    %9 = vector.broadcast %8 : vector<1x128xf32> to vector<8x128xf32>
    %10 = arith.mulf %7, %9 : vector<8x128xf32>
    %cst_8 = arith.constant dense<0.000000e+00> : vector<8xf32>
    %11 = vector.multi_reduction <add>, %10, %cst_8 [1] : vector<8x128xf32> to vector<8xf32>
    %12 = vector.shape_cast %11 : vector<8xf32> to vector<8x1xf32>
    %c0_9 = arith.constant 0 : index
    %13 = memref.load %arg5[%c0_9] : memref<1xf32, #tpu.memory_space<smem>>
    %14 = vector.broadcast %13 : f32 to vector<8x1xf32>
    %15 = arith.addf %12, %14 : vector<8x1xf32>
    %c0_10 = arith.constant 0 : index
    %c0_11 = arith.constant 0 : index
    %16 = vector.load %arg6[%c0_10, %c0_11] : memref<8x1xf32, #tpu.memory_space<vmem>>, vector<8x1xf32>
    tpu.vector_store %arg6[%c0_10, %c0_11], %15 {strides = array<i32>} : memref<8x1xf32, #tpu.memory_space<vmem>>, vector<8x1xf32>,
    return
  }
  func.func @transform_0(%arg0: i32) -> (i32, i32) {
    %c0_i32 = arith.constant 0 : i32
    %c0_i32_0 = arith.constant 0 : i32
    return %arg0, %c0_i32 : i32, i32
  }
  func.func @transform_1(%arg0: i32) -> (i32, i32) {
    %c0_i32 = arith.constant 0 : i32
    %c0_i32_0 = arith.constant 0 : i32
    %c0_i32_1 = arith.constant 0 : i32
    return %c0_i32, %c0_i32_0 : i32, i32
  }
  func.func @transform_2(%arg0: i32) -> (i32, i32) {
    %c0_i32 = arith.constant 0 : i32
    %c0_i32_0 = arith.constant 0 : i32
    %c0_i32_1 = arith.constant 0 : i32
    return %c0_i32, %c0_i32_0 : i32, i32
  }
  func.func @transform_3(%arg0: i32) -> (i32, i32) {
    %c0_i32 = arith.constant 0 : i32
    %c0_i32_0 = arith.constant 0 : i32
    %c0_i32_1 = arith.constant 0 : i32
    return %c0_i32, %c0_i32_0 : i32, i32
  }
  func.func @transform_4(%arg0: i32) -> i32 {
    %c0_i32 = arith.constant 0 : i32
    %c0_i32_0 = arith.constant 0 : i32
    return %c0_i32 : i32
  }
  func.func @transform_5(%arg0: i32) -> (i32, i32) {
    %c0_i32 = arith.constant 0 : i32
    %c0_i32_0 = arith.constant 0 : i32
    return %arg0, %c0_i32 : i32, i32
  }
}

</mosaic_0001>

<bundles_post_ra>
// kernel: regression_model_forward.1
= control target key start
LH: loop header
LB: loop body
LE: loop exit
PB: predicated region body
PF: predicated region fallthrough
CT: control target
= control target key end

     0   :  { %11 = vsyncpa [#allocation4], 0  ;;  %s315_s0 = inlined_call_operand.hbm [shape: f32[8,32], index: 0, kind: input, shape index: {}]   ;;  %s316_s1 = inlined_call_operand.hbm [shape: f32[32,128], index: 1, kind: input, shape index: {}]   ;;  %s317_s2 = inlined_call_operand.vmem [shape: f32[1,128], index: 2, kind: input, shape index: {}]   ;;  %s318_s3 = inlined_call_operand.vmem [shape: f32[1,128], index: 3, kind: input, shape index: {}]   ;;  %s319_s4 = inlined_call_operand.<no memory space> [shape: f32[1], index: 4, kind: input, shape index: {}]   ;;  %s320_s5 = inlined_call_operand.vmem [shape: f32[8,1], index: 5, kind: output, shape index: {}]  }
   0x1   :  { %12 = vsyncpa [#allocation6], 0  ;;  %s235_s18 = smov [#allocation3]   ;;  %s236_s20 = smov [#allocation5]  }
   0x2   :  { %s19_s19 = sshll.u32 %s235_s18, 4  ;;  %s28_s21 = sshll.u32 %s236_s20, 4  ;;  %s20_s19 = int_to_ptr.vmem [resolvable:$true] %s19_s19  ;;  %s272_s21 = int_to_ptr.vmem [resolvable:$true] %s28_s21 }
   0x3   :  { %s187_s24 = scalar_lea.hbm %s315_s0, 128 }
   0x4   :  { %p188_p0 = scmp.ne.s32.totalorder %s315_s0, %s187_s24  ;;  %p191_p1 = scmp.lt.u32.totalorder %s187_s24, %s315_s0 }
   0x6   :  { %p193_p2 = pnand %p191_p1, %p188_p0 }
   0x8   :  { %196 = shalt.err (!%p193_p2)
}
   0x9   :  { %s197_s29 = scalar_lea.vmem %s20_s19, 128  ;;  %p202_p4 = scmp.lt.s32.totalorder %s20_s19, %s20_s19 }
   0xa   :  { %p198_p3 = scmp.ne.s32.totalorder %s20_s19, %s197_s29  ;;  %p203_p5 = scmp.lt.s32.totalorder %s197_s29, %s197_s29 }
   0xc   :  { %p204_p6 = por %p203_p5, %p202_p4 }
   0xe   :  { %p205_p7 = pnand %p204_p6, %p198_p3 }
  0x10   :  { %208 = shalt.err (!%p205_p7)
}
  0x11   :  { %22 = dma.hbm_to_vmem [thread:$0]  %s315_s0, 128, %s20_s19, [#allocation4]  }
  0x12   :  { %s209_s9 = scalar_lea.hbm %s316_s1, 512 }
  0x13   :  { %p210_p8 = scmp.ne.s32.totalorder %s316_s1, %s209_s9  ;;  %p213_p9 = scmp.lt.u32.totalorder %s209_s9, %s316_s1 }
  0x15   :  { %p215_p10 = pnand %p213_p9, %p210_p8 }
  0x17   :  { %218 = shalt.err (!%p215_p10)
}
  0x18   :  { %s219_s14 = scalar_lea.vmem %s272_s21, 512  ;;  %p224_p12 = scmp.lt.s32.totalorder %s272_s21, %s272_s21 }
  0x19   :  { %p220_p11 = scmp.ne.s32.totalorder %s272_s21, %s219_s14  ;;  %p225_p13 = scmp.lt.s32.totalorder %s219_s14, %s219_s14 }
  0x1b   :  { %p226_p0 = por %p225_p13, %p224_p12 }
  0x1d   :  { %p227_p1 = pnand %p226_p0, %p220_p11 }
  0x1f   :  { %230 = shalt.err (!%p227_p1)
}
  0x20   :  { %s237_s0 = smov 128   ;;  %s238_s15 = smov 8  }
  0x21   :  { %34 = dma.hbm_to_vmem [thread:$0]  %s316_s1, 512, %s272_s21, [#allocation6], %s237_s0, %s237_s0, %s238_s15  }
  0x22   :  { %231 = dma.done.wait [#allocation4], 128  }
  0x23   :  { %232 = vsyncadd [#allocation4], 4294967168 }
  0x24   :  { %233 = dma.done.wait [#allocation6], 512  }
  0x25   :  { %234 = vsyncadd [#allocation6], 4294966784  ;;  %v239_v0 = vmov 0.0|0.0   ;;  %vm240_vm0 = vmmov 0   ;;  %v241_v1 = vmov 0.0   ;;  %v48_v2 = vld [vmem:[#allocation5] sm:$0xff]  ;;  %v145_v16 = vstv %s319_s4 }
  0x26   :  { %174 = vmatprep.subr.bf16.mxu0 %v239_v0  ;;  %171 = vmatprep.mubr.msk.f32.mxu0 %vm240_vm0, %v241_v1  ;;  %v49_v3 = vld [vmem:[#allocation5 + $0x8] sm:$0xff]  ;;  %v50_v4 = vld [vmem:[#allocation5 + $0x10] sm:$0xff]  ;;  %v51_v6 = vld [vmem:[#allocation5 + $0x18] sm:$0xff]  ;;  %vm59_vm1 = vcmask 261120   ;;  %vm147_vm2 = vcmask 7168  }
  0x27   :  { %v175_v5 = vpack.c.bf16 %v49_v3, %v48_v2  ;;  %v178_v7 = vpack.c.bf16 %v51_v6, %v50_v4  ;;  %v47_v8 = vld [vmem:[#allocation3] sm:$0xff] }
  0x28   :  { %v155_v9 = vld [vmem:[%s317_s2] ss:$0 sm:$0xff] }
  0x29   :  { %176 = vmatpush3.bf16.msra.mxu0 %v175_v5  ;;  %v157_v13 = vld [vmem:[%s318_s3] ss:$0 sm:$0xff] }
  0x2a   :  { %177 = vmatprep.subr.bf16.mxu0 %v239_v0 }
  0x2d   :  { %179 = vmatpush3.bf16.msra.mxu0 %v178_v7 }
  0x30   :  { %172 = vmatmul.mubr.msk.f32.vlgmr.msra.gmra.mrb[0].mxu0 %vm59_vm1, %v47_v8 }
 0x103   :  { %v129_v10 = vpop.f32.mrb[0].mxu0 }
 0x104   :  { %v130_v11 = vadd.f32 %v155_v9, %v129_v10  ;;  %v173_v12 = vpop.f32.mrb[1].mxu0 }
 0x106   :  { %v133_v14 = vmax.f32 %v130_v11, 0.0 }
 0x108   :  { %v141_v15 = vmul.f32 %v157_v13, %v133_v14 }
 0x10a   :  { %142 = vadd.xlane.f32.xlu0 %v141_v15 }
 0x197   :  { %v143_v17 = vpop.xlane.xlu0 %142 }
 0x198   :  { %v146_v18 = vadd.f32 %v145_v16, %v143_v17 }
 0x19a   :  { %148 = vst.msk [vmem:[%s320_s5] sm:$0xff] %vm147_vm2, %v146_v18 }
 0x19b   :  { %153 = vsyncpa [#allocation4], 1 }
 0x19c   :  { %154 = vsyncpa [#allocation6], 1 }

</bundles_post_ra>
